<compile_context>
chip_gen: v7x
topology: tpu7x:2x2x1
jax: 0.10.0
libtpu: 0.0.40
codegen_flags: <defaults>
</compile_context>

<pallas_src>
import jax
import jax.numpy as jnp
from jax.experimental import pallas as pl
from jax.experimental.pallas import tpu as pltpu

# ---- scaled-down problem size (original: Ci=381, Co=785) ----
C_IN = 4
C_OUT = 8
K = 2
KK = K * K
N = C_OUT * KK                        # flattened (c_out, kh, kw) axis

LANE = 128

# Column-tile size: equal to N when N fits in one lane group (toy scale), otherwise a
# multiple of 128 (lane-dense, unmasked vst except the one ragged edge tile).  At full
# scale (N=3140) this gives TN=1024 -> 4 tiles: even count for v7x megacore, few enough
# steps (~0.35us each) for single-TC v5e/v6e.
if N <= LANE:
    TN = N
else:
    TN = LANE * min(8, pl.cdiv(N, LANE))
GRID_N = pl.cdiv(N, TN)
assert TN % KK == 0


def _convt_mul_kernel(x_ref, w_ref, b_ref, m_ref, o_ref):
    # x_ref: (1, Ci)      input pixel, all input channels (constant index, DMA'd once)
    # w_ref: (Ci, TN)     ConvTranspose2d weight tile, columns = (c_out, kh, kw)
    # b_ref: (1, TN)      bias repeated per KK (tiny wrapper-side array)
    # m_ref: (Co, TN)     tile-invariant multiplier: weight_0[c1, col % KK]
    # o_ref: (Co, TN)     output tile of v3 = v1 * weight_0
    y = jnp.dot(x_ref[...], w_ref[...], preferred_element_type=jnp.float32)  # (1, TN)
    y = y + b_ref[...]
    o_ref[...] = (y * m_ref[...]).astype(o_ref.dtype)        # broadcast over c1 rows


@jax.jit
def model_forward(x, conv_w, conv_b, weight_0):
    # x: (1, Ci, 1, 1); conv_w: (Ci, Co, K, K); conv_b: (Co,); weight_0: (Co, 1, K, K)
    x2d = x.reshape(1, C_IN)
    w2d = conv_w.reshape(C_IN, N)                  # layout-only reshape
    b_rep = jnp.repeat(conv_b, KK).reshape(1, N)   # tiny (N floats)

    # Tile-invariant multiplier block: m_tile[c1, l] = weight_0[c1, l % KK].
    # Valid for every grid step because TN % KK == 0, so each tile starts KK-aligned.
    m_tile = jnp.tile(weight_0.reshape(C_OUT, KK), (1, TN // KK))   # (Co, TN)

    cost = pl.CostEstimate(
        flops=2 * C_IN * N,
        transcendentals=0,
        bytes_accessed=4 * (C_IN * N + C_OUT * N + C_OUT * TN + N + C_IN),
    )

    out2d = pl.pallas_call(
        _convt_mul_kernel,
        out_shape=jax.ShapeDtypeStruct((C_OUT, N), jnp.float32),
        grid=(GRID_N,),
        in_specs=[
            pl.BlockSpec((1, C_IN), lambda j: (0, 0)),      # reused every step
            pl.BlockSpec((C_IN, TN), lambda j: (0, j)),     # weight tile, double-buffered
            pl.BlockSpec((1, TN), lambda j: (0, j)),        # repeated-bias tile
            pl.BlockSpec((C_OUT, TN), lambda j: (0, 0)),    # multiplier tile, DMA'd once
        ],
        out_specs=pl.BlockSpec((C_OUT, TN), lambda j: (0, j)),
        compiler_params=pltpu.CompilerParams(
            # independent N tiles -> both v7x TensorCores take half the columns;
            # no-op on single-TC v5e/v6e.
            dimension_semantics=("parallel",),
            # headroom for the full-scale tiling on v5e's 16 MiB default scoped VMEM;
            # well under v7x's 64 MiB physical VMEM.
            vmem_limit_bytes=32 * 1024 * 1024,
        ),
        cost_estimate=cost,
    )(x2d, w2d, b_rep, m_tile)

    # (Co, N) -> (Co, Co, K, K): contiguous reshape, matches (1,Co,2,2)*(Co,1,2,2)
    return out2d.reshape(C_OUT, C_OUT, K, K)


def _reference(x, conv_w, conv_b, weight_0):
    v1 = jnp.einsum("i,iokl->okl", x[0, :, 0, 0], conv_w) + conv_b[:, None, None]
    return v1[None] * weight_0           # (1,Co,2,2)*(Co,1,2,2) -> (Co,Co,2,2)


if __name__ == "__main__":
    key = jax.random.PRNGKey(0)
    k_x, k_w, k_b, k_m = jax.random.split(key, 4)

    x = jax.random.normal(k_x, (1, C_IN, 1, 1), dtype=jnp.float32)
    conv_w = jax.random.normal(k_w, (C_IN, C_OUT, K, K), dtype=jnp.float32) * 0.1
    conv_b = jax.random.normal(k_b, (C_OUT,), dtype=jnp.float32) * 0.1
    # module initializes weight_0 = ones(785,1,2,2); random values here exercise the
    # broadcast-multiplier path (forward semantics identical).
    weight_0 = jax.random.normal(k_m, (C_OUT, 1, K, K), dtype=jnp.float32)

    out = jax.block_until_ready(model_forward(x, conv_w, conv_b, weight_0))
    ref = _reference(x, conv_w, conv_b, weight_0)

    assert out.shape == (C_OUT, C_OUT, K, K), out.shape
    assert jnp.allclose(out, ref, atol=1e-5, rtol=1e-5), "mismatch vs reference"

    print("KERNEL_OK")
</pallas_src>

<mosaic_0001>
module attributes {stable_mosaic.version = 11 : i64} {
  func.func @_convt_mul_kernel(%arg0: i32, %arg1: memref<1x4xf32, #tpu.memory_space<vmem>>, %arg2: memref<4x32xf32, #tpu.memory_space<vmem>>, %arg3: memref<1x32xf32, #tpu.memory_space<vmem>>, %arg4: memref<8x32xf32, #tpu.memory_space<vmem>>, %arg5: memref<8x32xf32, #tpu.memory_space<vmem>>) attributes {dimension_semantics = [#tpu.dimension_semantics<parallel>], iteration_bounds = array<i64: 1>, scalar_prefetch = 0 : i64, scratch_operands = 0 : i64, tpu.core_type = #tpu.core_type<tc>, window_params = [{pipeline_mode = #tpu.pipeline_mode<synchronous>, transform_indices = @transform_0, window_bounds = array<i64: 1, 4>}, {transform_indices = @transform_1, window_bounds = array<i64: 4, 32>}, {transform_indices = @transform_2, window_bounds = array<i64: 1, 32>}, {pipeline_mode = #tpu.pipeline_mode<synchronous>, transform_indices = @transform_3, window_bounds = array<i64: 8, 32>}, {transform_indices = @transform_4, window_bounds = array<i64: 8, 32>}]} {
    %c0 = arith.constant 0 : index
    %c0_0 = arith.constant 0 : index
    %0 = vector.load %arg1[%c0, %c0_0] : memref<1x4xf32, #tpu.memory_space<vmem>>, vector<1x4xf32>
    %c0_1 = arith.constant 0 : index
    %c0_2 = arith.constant 0 : index
    %1 = vector.load %arg2[%c0_1, %c0_2] : memref<4x32xf32, #tpu.memory_space<vmem>>, vector<4x32xf32>
    %cst = arith.constant dense<0.000000e+00> : vector<1x32xf32>
    %2 = tpu.matmul %0, %1, %cst {dimension_numbers = #tpu.dot_dimension_numbers<[1], [0], [0], [1], [0, 0, 1, 1], [], []>} : vector<1x4xf32>, vector<4x32xf32>, vector<1x32xf32> -> vector<1x32xf32>
    %c0_3 = arith.constant 0 : index
    %c0_4 = arith.constant 0 : index
    %3 = vector.load %arg3[%c0_3, %c0_4] : memref<1x32xf32, #tpu.memory_space<vmem>>, vector<1x32xf32>
    %4 = arith.addf %2, %3 : vector<1x32xf32>
    %c0_5 = arith.constant 0 : index
    %c0_6 = arith.constant 0 : index
    %5 = vector.load %arg4[%c0_5, %c0_6] : memref<8x32xf32, #tpu.memory_space<vmem>>, vector<8x32xf32>
    %6 = vector.broadcast %4 : vector<1x32xf32> to vector<8x32xf32>
    %7 = arith.mulf %6, %5 : vector<8x32xf32>
    %c0_7 = arith.constant 0 : index
    %c0_8 = arith.constant 0 : index
    %8 = vector.load %arg5[%c0_7, %c0_8] : memref<8x32xf32, #tpu.memory_space<vmem>>, vector<8x32xf32>
    tpu.vector_store %arg5[%c0_7, %c0_8], %7 {strides = array<i32>} : memref<8x32xf32, #tpu.memory_space<vmem>>, vector<8x32xf32>,
    return
  }
  func.func @transform_0(%arg0: i32) -> (i32, i32) {
    %c0_i32 = arith.constant 0 : i32
    %c0_i32_0 = arith.constant 0 : i32
    %c0_i32_1 = arith.constant 0 : i32
    return %c0_i32, %c0_i32_0 : i32, i32
  }
  func.func @transform_1(%arg0: i32) -> (i32, i32) {
    %c0_i32 = arith.constant 0 : i32
    %c0_i32_0 = arith.constant 0 : i32
    return %c0_i32, %arg0 : i32, i32
  }
  func.func @transform_2(%arg0: i32) -> (i32, i32) {
    %c0_i32 = arith.constant 0 : i32
    %c0_i32_0 = arith.constant 0 : i32
    return %c0_i32, %arg0 : i32, i32
  }
  func.func @transform_3(%arg0: i32) -> (i32, i32) {
    %c0_i32 = arith.constant 0 : i32
    %c0_i32_0 = arith.constant 0 : i32
    %c0_i32_1 = arith.constant 0 : i32
    return %c0_i32, %c0_i32_0 : i32, i32
  }
  func.func @transform_4(%arg0: i32) -> (i32, i32) {
    %c0_i32 = arith.constant 0 : i32
    %c0_i32_0 = arith.constant 0 : i32
    return %c0_i32, %arg0 : i32, i32
  }
}

</mosaic_0001>

<bundles_post_ra>
// kernel: model_forward.1
= control target key start
LH: loop header
LB: loop body
LE: loop exit
PB: predicated region body
PF: predicated region fallthrough
CT: control target
= control target key end

     0   :  { %vm24_vm0 = vcmask 1043456   ;;  %vm20_vm1 = vcmask 31744   ;;  %v121_v0 = vmov 0.0   ;;  %vm122_vm2 = vmmov 0   ;;  %s163_s1 = inlined_call_operand.vmem [shape: f32[4,32], index: 1, kind: input, shape index: {}]   ;;  %s164_s0 = inlined_call_operand.vmem [shape: f32[1,4], index: 0, kind: input, shape index: {}]   ;;  %s165_s2 = inlined_call_operand.vmem [shape: f32[1,32], index: 2, kind: input, shape index: {}]   ;;  %s166_s3 = inlined_call_operand.vmem [shape: f32[8,32], index: 3, kind: input, shape index: {}]   ;;  %s167_s4 = inlined_call_operand.vmem [shape: f32[8,32], index: 4, kind: output, shape index: {}]  }
   0x1   :  { %114 = vmatprep.subr.mxu0 %v121_v0  ;;  %v18_v1 = vld [vmem:[%s163_s1] sm:$0xf]  ;;  %116 = vmatprep.mubr.msk.f32.mxu0 %vm122_vm2, %v121_v0  ;;  %v99_v3 = vlaneseq  ;;  %vm104_vm3 = vcmask 261120  }
   0x2   :  { %v17_v2 = vld [vmem:[%s164_s0] sm:$0x1]  ;;  %115 = vmatpush3.msk.msra.mxu0 %vm24_vm0, %v18_v1 }
   0x3   :  { %117 = vmatmul.mubr.msk.f32.vlgmr.msra.gmra.mrb[0].mxu0 %vm20_vm1, %v17_v2  ;;  %v100_v4 = vshrl.u32 %v99_v3, 7  ;;  %v19_v5 = vld [vmem:[%s165_s2] sm:$0x1] }
   0x4   :  { %v98_v10 = vld [vmem:[%s166_s3] sm:$0xff] }
   0x5   :  { %v101_v6 = vsub.s32 0, %v100_v4 }
  0xd6   :  { %v94_v7 = vpop.f32.mrb[0].mxu0 }
  0xd7   :  { %v95_v8 = vadd.f32 %v94_v7, %v19_v5  ;;  %v118_v9 = vpop.f32.mrb[1].mxu0 }
  0xd9   :  { %v102_v11 = vrot.slane %v95_v8, %v101_v6 }
  0xdb   :  { %v103_v12 = vmul.f32 %v102_v11, %v98_v10 }
  0xdd   :  { %105 = vst.msk [vmem:[%s167_s4] sm:$0xff] %vm104_vm3, %v103_v12 }

</bundles_post_ra>
